<compile_context>
chip_gen: v5e
topology: v5e:2x2
jax: 0.10.0
libtpu: 0.0.40
codegen_flags: <defaults>
</compile_context>

<pallas_src>
import functools

import jax
import jax.numpy as jnp
from jax import lax
from jax.experimental import pallas as pl
from jax.experimental.pallas import tpu as pltpu

N_CLASS = 5
MODEL_ARCH = "tf_efficientnet_b4_ns"                      # model_choice = 0
FPN_SIZES = [24, 32, 56, 112, 160, 272, 448]              # fpn_dim[model_arch]
FPN_SPATIAL = [8, 8, 4, 4, 2, 2, 2]                       # synthetic block resolutions
LANE = 128                                                # lane-dense padding width


def _round_up(x, m):
    return ((x + m - 1) // m) * m


def _device_cfg():
    """Per-generation tiling / VMEM budget (v5e / v6e / v7x)."""
    kind = ""
    try:
        kind = jax.devices()[0].device_kind.lower()
    except Exception:
        pass
    if "v5 lite" in kind or "v5e" in kind or "v5litepod" in kind:
        # 128x128 MXU (128 rows already fill it); 128 MiB physical, 16 MiB scoped default.
        return {"batch_tile": 128, "x_budget": 32 << 20, "vmem_cap": 100 << 20}
    if "v7" in kind:
        # 64 MiB physical VMEM: keep the double-buffered x tile well under budget.
        return {"batch_tile": 256, "x_budget": 24 << 20, "vmem_cap": 48 << 20}
    # v6e / default: 256-wide MXU, 128 MiB physical VMEM.
    return {"batch_tile": 256, "x_budget": 48 << 20, "vmem_cap": 100 << 20}


# ---------------------------------------------------------------------------
# Fused Pallas kernel: pooled-sum accumulate -> packed classifiers -> ReLU -> ensemble
# ---------------------------------------------------------------------------
def _fused_head_kernel(x_ref, w_head_ref, b_head_ref, w_ens_ref, b_ens_ref, o_ref,
                       acc_ref, *, hw, hw_tile, mask_tail):
    k = pl.program_id(1)                                   # HW reduction step

    @pl.when(k == 0)
    def _init():
        acc_ref[...] = jnp.zeros_like(acc_ref)

    # x tile: (BT, C, HW_TILE) in bf16 -> f32; pooled sum accumulates over HW steps.
    xv = x_ref[...].astype(jnp.float32)
    if mask_tail:                                          # zero the HW tail padding
        lane = lax.broadcasted_iota(jnp.int32, xv.shape, 2)
        xv = jnp.where(k * hw_tile + lane < hw, xv, 0.0)
    acc_ref[...] += jnp.sum(xv, axis=-1)                   # (BT, C)

    @pl.when(k == pl.num_programs(1) - 1)
    def _finalize():
        # 1/(H*W) is pre-folded into w_head, so acc is already the "mean" operand.
        logits = (jnp.dot(acc_ref[...], w_head_ref[...],
                          preferred_element_type=jnp.float32)
                  + b_head_ref[...])                       # (BT, 128), padded lanes = 0
        act = jnp.maximum(logits, 0.0)                     # ReLU
        o_ref[...] = (jnp.dot(act, w_ens_ref[...],
                              preferred_element_type=jnp.float32)
                      + b_ens_ref[...])                    # (BT, 128) lane-dense store


def fused_head(x_nchw, w_head, b_head, w_ens, b_ens):
    n, c, h, w = x_nchw.shape
    hw = h * w

    # bf16 input DMA (halves HBM bytes / VMEM footprint); f32 accumulation in-kernel.
    if x_nchw.dtype != jnp.bfloat16:
        x_nchw = x_nchw.astype(jnp.bfloat16)
    x3 = x_nchw.reshape(n, c, hw)

    cfg = _device_cfg()
    bt = min(cfg["batch_tile"], _round_up(n, 8))
    # Dual-TC (v7x): keep >= 2 steps on the "parallel" batch axis when batch allows.
    if n > 8 and pl.cdiv(n, bt) < 2:
        bt = _round_up(pl.cdiv(n, 2), 8)
    n_bt = pl.cdiv(n, bt)

    # HW reduction tiling: keep the double-buffered x tile under the per-chip budget.
    itemsize = x3.dtype.itemsize
    if 2 * bt * c * hw * itemsize <= cfg["x_budget"]:
        hw_tile = hw
    else:
        hw_tile = max(128, (cfg["x_budget"] // (2 * bt * c * itemsize)) // 128 * 128)
    n_hw = pl.cdiv(hw, hw_tile)
    mask_tail = (n_hw * hw_tile != hw)

    # Fold 1/(H*W) into the packed classifier weight (mean pool == sum @ (W/HW)).
    w_head = w_head * jnp.float32(1.0 / hw)

    # Explicit VMEM limit only when the tiles push past the scoped default.
    needed = (2 * bt * c * hw_tile * itemsize                      # x (double-buffered)
              + 2 * bt * LANE * 4                                  # output (double-buffered)
              + 2 * (c * LANE + LANE + LANE * LANE + LANE) * 4     # weights / biases
              + bt * c * 4)                                        # pooled-sum accumulator
    vmem_limit = None
    if needed > (24 << 20):
        vmem_limit = int(min(needed + (8 << 20), cfg["vmem_cap"]))

    out = pl.pallas_call(
        functools.partial(_fused_head_kernel, hw=hw, hw_tile=hw_tile,
                          mask_tail=mask_tail),
        grid=(n_bt, n_hw),
        in_specs=[
            pl.BlockSpec((bt, c, hw_tile), lambda i, k: (i, 0, k)),
            pl.BlockSpec((c, LANE), lambda i, k: (0, 0)),
            pl.BlockSpec((1, LANE), lambda i, k: (0, 0)),
            pl.BlockSpec((LANE, LANE), lambda i, k: (0, 0)),
            pl.BlockSpec((1, LANE), lambda i, k: (0, 0)),
        ],
        out_specs=pl.BlockSpec((bt, LANE), lambda i, k: (i, 0)),
        out_shape=jax.ShapeDtypeStruct((n, LANE), jnp.float32),
        scratch_shapes=[pltpu.VMEM((bt, c), jnp.float32)],
        compiler_params=pltpu.CompilerParams(
            dimension_semantics=("parallel", "arbitrary"),
            vmem_limit_bytes=vmem_limit),
    )(x3, w_head, b_head, w_ens, b_ens)

    # Slice out the 5 real ensemble outputs (padded lanes are exactly zero-derived).
    return out[:, :N_CLASS]


# ---------------------------------------------------------------------------
# Host-side weight packing (tiny, done once per forward in XLA)
# ---------------------------------------------------------------------------
def pack_head_weights(params):
    m = len(FPN_SIZES)
    f = (1 + m) * N_CLASS
    assert f <= LANE, (
        f"packed classifier width {f} exceeds the {LANE}-lane slab; "
        "raise LANE (multiple of 128) or split the packed head")
    # Fold the per-level 1x1 projection into its FPN classifier:
    #   pooled(proj_i(x)) @ fpn_W[i] == pooled(x) @ (proj_W[i] @ fpn_W[i])
    level_w = [params["proj_w"][i] @ params["fpn_w"][i] for i in range(m)]       # (C_in, K)
    w_head = jnp.concatenate([params["cls_w"]] + level_w, axis=1)                # (C_in, F)
    b_head = jnp.concatenate([params["cls_b"]] + params["fpn_b"], axis=1)        # (1, F)
    w_head = jnp.pad(w_head, ((0, 0), (0, LANE - f)))
    b_head = jnp.pad(b_head, ((0, 0), (0, LANE - f)))
    w_ens = jnp.pad(params["ens_w"], ((0, LANE - f), (0, LANE - N_CLASS)))
    b_ens = jnp.pad(params["ens_b"], ((0, 0), (0, LANE - N_CLASS)))
    return w_head, b_head, w_ens, b_ens


# ---------------------------------------------------------------------------
# Parameters (deterministic synthetic init — shapes follow the module __init__)
# ---------------------------------------------------------------------------
def make_params(key, in_chans, n_class=N_CLASS):
    m = len(FPN_SIZES)
    ks = jax.random.split(key, 3 * m + 4)
    p = {}
    # stand-in backbone 1x1 channel projections (glue for the untranslatable backbone)
    p["proj_w"] = [
        0.1 * jax.random.normal(ks[i], (in_chans, FPN_SIZES[i]), jnp.float32)
        for i in range(m)
    ]
    # backbone classifier head: Linear(in_features, n_class) -> orig_result
    p["cls_w"] = 0.1 * jax.random.normal(ks[m], (in_chans, n_class), jnp.float32)
    p["cls_b"] = 0.1 * jax.random.normal(ks[m + 1], (1, n_class), jnp.float32)
    # fpn_classifiers[i] = Linear(fpn_sizes[i], n_class)
    p["fpn_w"] = [
        0.1 * jax.random.normal(ks[m + 2 + i], (FPN_SIZES[i], n_class), jnp.float32)
        for i in range(m)
    ]
    p["fpn_b"] = [
        0.1 * jax.random.normal(ks[2 * m + 2 + i], (1, n_class), jnp.float32)
        for i in range(m)
    ]
    # ensemble = Linear((1 + len(fpn_sizes)) * n_class, n_class)
    p["ens_w"] = 0.1 * jax.random.normal(
        ks[3 * m + 2], ((1 + m) * n_class, n_class), jnp.float32
    )
    p["ens_b"] = 0.1 * jax.random.normal(ks[3 * m + 3], (1, n_class), jnp.float32)
    return p


# ---------------------------------------------------------------------------
# Forward pass (fused Pallas head)
# ---------------------------------------------------------------------------
def cassva_forward(params, x):
    w_head, b_head, w_ens, b_ens = pack_head_weights(params)
    return fused_head(x, w_head, b_head, w_ens, b_ens)


# ---------------------------------------------------------------------------
# Pure-JAX reference (mirrors the original, unfused head structure exactly)
# ---------------------------------------------------------------------------
def _downsample_mean(x, s):
    n, c, h, w = x.shape
    f = h // s
    return x.reshape(n, c, s, f, s, f).mean(axis=(3, 5))


def cassva_forward_ref(params, x):
    pooled_x = x.mean(axis=(2, 3))
    orig_result = pooled_x @ params["cls_w"] + params["cls_b"]
    fpn_results = []
    for i, s in enumerate(FPN_SPATIAL):
        xs = _downsample_mean(x, s)
        feat = jnp.einsum("nchw,cd->ndhw", xs, params["proj_w"][i])
        pooled = feat.mean(axis=(2, 3))                     # AvgPool2d(full).reshape(-1)
        fpn_results.append(pooled @ params["fpn_w"][i] + params["fpn_b"][i])
    all_results = jnp.concatenate([orig_result] + fpn_results, axis=1)
    all_results = jnp.maximum(all_results, 0.0)
    return all_results @ params["ens_w"] + params["ens_b"]


if __name__ == "__main__":
    key = jax.random.PRNGKey(0)
    k_x, k_p = jax.random.split(key)

    N, C_IN, H, W = 2, 4, 16, 16
    x = jax.random.normal(k_x, (N, C_IN, H, W), dtype=jnp.float32)
    params = make_params(k_p, in_chans=C_IN, n_class=N_CLASS)

    # Producer-side bf16 cast: the kernel DMAs bf16 and accumulates in f32.
    x_bf16 = x.astype(jnp.bfloat16)

    out = jax.block_until_ready(cassva_forward(params, x_bf16))
    assert out.shape == (N, N_CLASS) and out.dtype == jnp.float32

    ref = jax.block_until_ready(cassva_forward_ref(params, x_bf16.astype(jnp.float32)))
    assert bool(jnp.allclose(out, ref, atol=1e-4, rtol=1e-4)), "fused kernel mismatch"

    print("KERNEL_OK")
</pallas_src>

<mosaic_0001>
module attributes {stable_mosaic.version = 11 : i64} {
  func.func @_fused_head_kernel(%arg0: i32, %arg1: i32, %arg2: memref<8x4x256xbf16, #tpu.memory_space<vmem>>, %arg3: memref<4x128xf32, #tpu.memory_space<vmem>>, %arg4: memref<1x128xf32, #tpu.memory_space<vmem>>, %arg5: memref<128x128xf32, #tpu.memory_space<vmem>>, %arg6: memref<1x128xf32, #tpu.memory_space<vmem>>, %arg7: memref<8x128xf32, #tpu.memory_space<vmem>>, %arg8: memref<8x4xf32, #tpu.memory_space<vmem>>) attributes {dimension_semantics = [#tpu.dimension_semantics<parallel>, #tpu.dimension_semantics<arbitrary>], iteration_bounds = array<i64: 1, 1>, scalar_prefetch = 0 : i64, scratch_operands = 1 : i64, tpu.core_type = #tpu.core_type<tc>, window_params = [{transform_indices = @transform_0, window_bounds = array<i64: 8, 4, 256>}, {pipeline_mode = #tpu.pipeline_mode<synchronous>, transform_indices = @transform_1, window_bounds = array<i64: 4, 128>}, {pipeline_mode = #tpu.pipeline_mode<synchronous>, transform_indices = @transform_2, window_bounds = array<i64: 1, 128>}, {pipeline_mode = #tpu.pipeline_mode<synchronous>, transform_indices = @transform_3, window_bounds = array<i64: 128, 128>}, {pipeline_mode = #tpu.pipeline_mode<synchronous>, transform_indices = @transform_4, window_bounds = array<i64: 1, 128>}, {transform_indices = @transform_5, window_bounds = array<i64: 8, 128>}]} {
    %c0_i32 = arith.constant 0 : i32
    %0 = arith.cmpi eq, %arg1, %c0_i32 : i32
    %1 = arith.extui %0 : i1 to i32
    %c0_i32_0 = arith.constant 0 : i32
    %2 = arith.cmpi ne, %1, %c0_i32_0 : i32
    scf.if %2 {
      %cst_9 = arith.constant 0.000000e+00 : f32
      %12 = vector.broadcast %cst_9 : f32 to vector<8x4xf32>
      %c0_10 = arith.constant 0 : index
      %c0_11 = arith.constant 0 : index
      %13 = vector.load %arg8[%c0_10, %c0_11] : memref<8x4xf32, #tpu.memory_space<vmem>>, vector<8x4xf32>
      tpu.vector_store %arg8[%c0_10, %c0_11], %12 {strides = array<i32>} : memref<8x4xf32, #tpu.memory_space<vmem>>, vector<8x4xf32>,
    } else {
    }
    %c0 = arith.constant 0 : index
    %c0_1 = arith.constant 0 : index
    %c0_2 = arith.constant 0 : index
    %3 = vector.load %arg2[%c0, %c0_1, %c0_2] : memref<8x4x256xbf16, #tpu.memory_space<vmem>>, vector<8x4x256xbf16>
    %4 = arith.extf %3 : vector<8x4x256xbf16> to vector<8x4x256xf32>
    %c0_3 = arith.constant 0 : index
    %c0_4 = arith.constant 0 : index
    %5 = vector.load %arg8[%c0_3, %c0_4] : memref<8x4xf32, #tpu.memory_space<vmem>>, vector<8x4xf32>
    %cst = arith.constant dense<0.000000e+00> : vector<8x4xf32>
    %6 = vector.multi_reduction <add>, %4, %cst [2] : vector<8x4x256xf32> to vector<8x4xf32>
    %7 = arith.addf %5, %6 : vector<8x4xf32>
    %c0_5 = arith.constant 0 : index
    %c0_6 = arith.constant 0 : index
    %8 = vector.load %arg8[%c0_5, %c0_6] : memref<8x4xf32, #tpu.memory_space<vmem>>, vector<8x4xf32>
    tpu.vector_store %arg8[%c0_5, %c0_6], %7 {strides = array<i32>} : memref<8x4xf32, #tpu.memory_space<vmem>>, vector<8x4xf32>,
    %c0_i32_7 = arith.constant 0 : i32
    %9 = arith.cmpi eq, %arg1, %c0_i32_7 : i32
    %10 = arith.extui %9 : i1 to i32
    %c0_i32_8 = arith.constant 0 : i32
    %11 = arith.cmpi ne, %10, %c0_i32_8 : i32
    scf.if %11 {
      %c0_9 = arith.constant 0 : index
      %c0_10 = arith.constant 0 : index
      %12 = vector.load %arg8[%c0_9, %c0_10] : memref<8x4xf32, #tpu.memory_space<vmem>>, vector<8x4xf32>
      %c0_11 = arith.constant 0 : index
      %c0_12 = arith.constant 0 : index
      %13 = vector.load %arg3[%c0_11, %c0_12] : memref<4x128xf32, #tpu.memory_space<vmem>>, vector<4x128xf32>
      %cst_13 = arith.constant dense<0.000000e+00> : vector<8x128xf32>
      %14 = tpu.matmul %12, %13, %cst_13 {dimension_numbers = #tpu.dot_dimension_numbers<[1], [0], [0], [1], [0, 0, 1, 1], [], []>} : vector<8x4xf32>, vector<4x128xf32>, vector<8x128xf32> -> vector<8x128xf32>
      %c0_14 = arith.constant 0 : index
      %c0_15 = arith.constant 0 : index
      %15 = vector.load %arg4[%c0_14, %c0_15] : memref<1x128xf32, #tpu.memory_space<vmem>>, vector<1x128xf32>
      %16 = vector.broadcast %15 : vector<1x128xf32> to vector<8x128xf32>
      %17 = arith.addf %14, %16 : vector<8x128xf32>
      %cst_16 = arith.constant 0.000000e+00 : f32
      %18 = vector.broadcast %cst_16 : f32 to vector<8x128xf32>
      %19 = arith.maximumf %17, %18 : vector<8x128xf32>
      %c0_17 = arith.constant 0 : index
      %c0_18 = arith.constant 0 : index
      %20 = vector.load %arg5[%c0_17, %c0_18] : memref<128x128xf32, #tpu.memory_space<vmem>>, vector<128x128xf32>
      %cst_19 = arith.constant dense<0.000000e+00> : vector<8x128xf32>
      %21 = tpu.matmul %19, %20, %cst_19 {dimension_numbers = #tpu.dot_dimension_numbers<[1], [0], [0], [1], [0, 0, 1, 1], [], []>} : vector<8x128xf32>, vector<128x128xf32>, vector<8x128xf32> -> vector<8x128xf32>
      %c0_20 = arith.constant 0 : index
      %c0_21 = arith.constant 0 : index
      %22 = vector.load %arg6[%c0_20, %c0_21] : memref<1x128xf32, #tpu.memory_space<vmem>>, vector<1x128xf32>
      %23 = vector.broadcast %22 : vector<1x128xf32> to vector<8x128xf32>
      %24 = arith.addf %21, %23 : vector<8x128xf32>
      %c0_22 = arith.constant 0 : index
      %c0_23 = arith.constant 0 : index
      %25 = vector.load %arg7[%c0_22, %c0_23] : memref<8x128xf32, #tpu.memory_space<vmem>>, vector<8x128xf32>
      tpu.vector_store %arg7[%c0_22, %c0_23], %24 {strides = array<i32>} : memref<8x128xf32, #tpu.memory_space<vmem>>, vector<8x128xf32>,
    } else {
    }
    return
  }
  func.func @transform_0(%arg0: i32, %arg1: i32) -> (i32, i32, i32) {
    %c0_i32 = arith.constant 0 : i32
    %c0_i32_0 = arith.constant 0 : i32
    return %arg0, %c0_i32, %arg1 : i32, i32, i32
  }
  func.func @transform_1(%arg0: i32, %arg1: i32) -> (i32, i32) {
    %c0_i32 = arith.constant 0 : i32
    %c0_i32_0 = arith.constant 0 : i32
    %c0_i32_1 = arith.constant 0 : i32
    return %c0_i32, %c0_i32_0 : i32, i32
  }
  func.func @transform_2(%arg0: i32, %arg1: i32) -> (i32, i32) {
    %c0_i32 = arith.constant 0 : i32
    %c0_i32_0 = arith.constant 0 : i32
    %c0_i32_1 = arith.constant 0 : i32
    return %c0_i32, %c0_i32_0 : i32, i32
  }
  func.func @transform_3(%arg0: i32, %arg1: i32) -> (i32, i32) {
    %c0_i32 = arith.constant 0 : i32
    %c0_i32_0 = arith.constant 0 : i32
    %c0_i32_1 = arith.constant 0 : i32
    return %c0_i32, %c0_i32_0 : i32, i32
  }
  func.func @transform_4(%arg0: i32, %arg1: i32) -> (i32, i32) {
    %c0_i32 = arith.constant 0 : i32
    %c0_i32_0 = arith.constant 0 : i32
    %c0_i32_1 = arith.constant 0 : i32
    return %c0_i32, %c0_i32_0 : i32, i32
  }
  func.func @transform_5(%arg0: i32, %arg1: i32) -> (i32, i32) {
    %c0_i32 = arith.constant 0 : i32
    %c0_i32_0 = arith.constant 0 : i32
    return %arg0, %c0_i32 : i32, i32
  }
}

</mosaic_0001>

<bundles_post_ra>
// kernel: tpu_custom_call.1
= control target key start
LH: loop header
LB: loop body
LE: loop exit
PB: predicated region body
PF: predicated region fallthrough
CT: control target
= control target key end

     0   :  { %10 = vsyncpa [#allocation4], 0  ;;  %s529_s0 = inlined_call_operand.hbm [shape: bf16[2,4,256], index: 0, kind: input, shape index: {}]   ;;  %s530_s1 = inlined_call_operand.hbm [shape: f32[4,128], index: 1, kind: input, shape index: {}]   ;;  %s531_s2 = inlined_call_operand.vmem [shape: f32[1,128], index: 2, kind: input, shape index: {}]   ;;  %s532_s3 = inlined_call_operand.hbm [shape: f32[128,128], index: 3, kind: input, shape index: {}]   ;;  %s533_s4 = inlined_call_operand.vmem [shape: f32[1,128], index: 4, kind: input, shape index: {}]   ;;  %s534_s5 = inlined_call_operand.hbm [shape: f32[2,128], index: 5, kind: output, shape index: {}]  }
   0x1   :  { %11 = vsyncpa [#allocation7], 0 }
   0x2   :  { %12 = vsyncpa [#allocation5], 0  ;;  %s31_s20 = sshll.u32 %s530_s1, 4  ;;  %s32_s20 = int_to_ptr.hbm [resolvable:$true] %s31_s20 }
   0x3   :  { %16 = vsyncadd [#allocation4], 384  ;;  %s450_s21 = smov [#allocation6]   ;;  %s17_s25 = sshll.u32 %s529_s0, 4  ;;  %s18_s25 = int_to_ptr.hbm [resolvable:$true] %s17_s25 }
   0x4   :  { %s33_s22 = sshll.u32 %s450_s21, 4  ;;  %s451_s26 = smov [#allocation3]   ;;  %s34_s22 = int_to_ptr.vmem [resolvable:$true] %s33_s22 }
   0x5   :  { %36 = dma.hbm_to_vmem [thread:$0]  %s32_s20, 64, %s34_s22, [#allocation7]  }
   0x6   :  { %s19_s27 = sshll.u32 %s451_s26, 4  ;;  %s452_s28 = smov 64   ;;  %s20_s27 = int_to_ptr.vmem [resolvable:$true] %s19_s27 }
   0x7   :  { %s453_s29 = smov 4   ;;  %s43_s1 = sshll.u32 %s532_s3, 4  ;;  %s44_s1 = int_to_ptr.hbm [resolvable:$true] %s43_s1 }
   0x8   :  { %25 = dma.hbm_to_vmem [thread:$0]  %s18_s25, 128, %s20_s27, [#allocation4], %s452_s28, %s452_s28, %s453_s29  }
   0x9   :  { %s454_s7 = smov [#allocation8]   ;;  %s455_s9 = smov 128  }
   0xa   :  { %s45_s8 = sshll.u32 %s454_s7, 4  ;;  %s456_s10 = smov 8   ;;  %s46_s8 = int_to_ptr.vmem [resolvable:$true] %s45_s8 }
   0xb   :  { %51 = dma.hbm_to_vmem [thread:$0]  %s44_s1, 2048, %s46_s8, [#allocation7], %s455_s9, %s455_s9, %s456_s10  }
   0xc   :  { %444 = dma.done.wait [#allocation4], 512  }
   0xd   :  { %445 = vsyncadd [#allocation4], 4294966784 }
   0xe   :  { %446 = dma.done.wait [#allocation7], 2112  }
   0xf   :  { %447 = vsyncadd [#allocation7], 4294965184  ;;  %v317_v0 = vld [vmem:[#allocation3] sm:$0xff]   ;;  %v332_v1 = vld [vmem:[#allocation3 + $0x8] sm:$0xff]   ;;  %vm140_vm0 = vcmask 1043456   ;;  %vm70_vm1 = vcmask 31744   ;;  %v189_v57 = vlaneseq }
  0x10   :  { %v318_v2 = vunpack.c.l.bf16 %v317_v0  ;;  %v322_v3 = vunpack.c.l.bf16 %v332_v1  ;;  %v319_v4 = vunpack.c.h.bf16 %v317_v0  ;;  %v323_v5 = vunpack.c.h.bf16 %v332_v1  ;;  %v333_v6 = vld [vmem:[#allocation3 + $0x10] sm:$0xff]   ;;  %v334_v7 = vld [vmem:[#allocation3 + $0x18] sm:$0xff]   ;;  %v221_v53 = vld [vmem:[#allocation6] sm:$0xf] }
  0x11   :  { %v326_v8 = vunpack.c.l.bf16 %v333_v6  ;;  %v330_v9 = vunpack.c.l.bf16 %v334_v7  ;;  %v327_v14 = vunpack.c.h.bf16 %v333_v6  ;;  %v331_v20 = vunpack.c.h.bf16 %v334_v7  ;;  %314 = vmatpush.msk.msra.mxu0 %vm140_vm0, %v221_v53  ;;  %v268_v55 = vld [vmem:[#allocation8 + $0x78] sm:$0xff]  ;;  %v267_v56 = vld [vmem:[#allocation8 + $0x70] sm:$0xff]  ;;  %v266_v59 = vld [vmem:[#allocation8 + $0x68] sm:$0xff] }
  0x12   :  { %97 = vst [vmem:[#allocation1] ss:$2 sm:$0xff] %v318_v2  ;;  %v457_v52 = vmov 0.0   ;;  %273 = vmatpush.msra.mxu1 %v268_v55  ;;  %v265_v60 = vld [vmem:[#allocation8 + $0x60] sm:$0xff]  ;;  %v190_v61 = vand.u32 127, %v189_v57  ;;  %v264_v62 = vld [vmem:[#allocation8 + $0x58] sm:$0xff] }
  0x13   :  { %105 = vst [vmem:[#allocation1 + $0x20] ss:$2 sm:$0xff] %v322_v3  ;;  %vm199_vm2 = vcmask 1041409   ;;  %v263_v1 = vld [vmem:[#allocation8 + $0x50] sm:$0xff]  ;;  %vm201_vm3 = vcmask 1042434   ;;  %v262_v6 = vld [vmem:[#allocation8 + $0x48] sm:$0xff] }
  0x14   :  { %101 = vst [vmem:[#allocation1 + $0x10] ss:$2 sm:$0xff] %v319_v4  ;;  %274 = vmatpush.msra.mxu1 %v267_v56  ;;  %vm203_vm4 = vcmask 1043459   ;;  %vm205_vm5 = vcmask 1044484   ;;  %vm207_vm6 = vcmask 1045509   ;;  %vm209_vm7 = vcmask 1046534  }
  0x15   :  { %109 = vst [vmem:[#allocation1 + $0x30] ss:$2 sm:$0xff] %v323_v5  ;;  %vm211_vm8 = vcmask 1047559  }
  0x16   :  { %71 = vst.msk [vmem:[#allocation2] sm:$0xff] %vm70_vm1, %v457_v52  ;;  %275 = vmatpush.msra.mxu1 %v266_v59 }
  0x18   :  { %276 = vmatpush.msra.mxu1 %v265_v60 }
  0x19   :  { %v98_v10 = vld.sshfl [vmem:[#allocation1] sm:$0xff pattern:$0x75316420]  ;;  %v99_v11 = vld.sshfl [vmem:[#allocation1 + $0x8] sm:$0xff pattern:$0x75316420] }
  0x1a   :  { %v141_v12 = vsel %vm140_vm0, %v98_v10, 0.0  ;;  %v142_v13 = vsel %vm140_vm0, %v99_v11, 0.0  ;;  %112 = vst [vmem:[#allocation1] ss:$2 sm:$0xff] %v326_v8  ;;  %277 = vmatpush.msra.mxu1 %v264_v62  ;;  %v261_v10 = vld [vmem:[#allocation8 + $0x40] sm:$0xff]  ;;  %v260_v11 = vld [vmem:[#allocation8 + $0x38] sm:$0xff] }
  0x1b   :  { %v143_v15 = vadd.f32 %v142_v13, %v141_v12  ;;  %v106_v16 = vld.sshfl [vmem:[#allocation1 + $0x20] sm:$0xff pattern:$0x75316420]  ;;  %v107_v17 = vld.sshfl [vmem:[#allocation1 + $0x28] sm:$0xff pattern:$0x75316420] }
  0x1c   :  { %v151_v18 = vsel %vm140_vm0, %v106_v16, 0.0  ;;  %v152_v19 = vsel %vm140_vm0, %v107_v17, 0.0  ;;  %118 = vst [vmem:[#allocation1 + $0x20] ss:$2 sm:$0xff] %v330_v9  ;;  %278 = vmatpush.msra.mxu1 %v263_v1  ;;  %v259_v16 = vld [vmem:[#allocation8 + $0x30] sm:$0xff] }
  0x1d   :  { %144 = vadd.xlane.f32.xlu0 %v143_v15  ;;  %v153_v21 = vadd.f32 %v152_v19, %v151_v18  ;;  %v102_v22 = vld.sshfl [vmem:[#allocation1 + $0x10] sm:$0xff pattern:$0x75316420]  ;;  %v103_v23 = vld.sshfl [vmem:[#allocation1 + $0x18] sm:$0xff pattern:$0x75316420] }
  0x1e   :  { %115 = vst [vmem:[#allocation1 + $0x10] ss:$2 sm:$0xff] %v327_v14  ;;  %v146_v24 = vsel %vm140_vm0, %v102_v22, 0.0  ;;  %v147_v25 = vsel %vm140_vm0, %v103_v23, 0.0  ;;  %279 = vmatpush.msra.mxu1 %v262_v6 }
  0x1f   :  { %154 = vadd.xlane.f32.xlu1 %v153_v21  ;;  %v110_v26 = vld.sshfl [vmem:[#allocation1 + $0x30] sm:$0xff pattern:$0x75316420]  ;;  %v111_v27 = vld.sshfl [vmem:[#allocation1 + $0x38] sm:$0xff pattern:$0x75316420]  ;;  %v148_v30 = vadd.f32 %v147_v25, %v146_v24 }
  0x20   :  { %121 = vst [vmem:[#allocation1 + $0x30] ss:$2 sm:$0xff] %v331_v20  ;;  %v156_v28 = vsel %vm140_vm0, %v110_v26, 0.0  ;;  %v157_v29 = vsel %vm140_vm0, %v111_v27, 0.0  ;;  %280 = vmatpush.msra.mxu1 %v261_v10  ;;  %v258_v21 = vld [vmem:[#allocation8 + $0x28] sm:$0xff]  ;;  %v88_v24 = vld [vmem:[#allocation2] sm:$0xff] }
  0x21   :  { %v113_v31 = vld.sshfl [vmem:[#allocation1] sm:$0xff pattern:$0x75316420]  ;;  %v114_v32 = vld.sshfl [vmem:[#allocation1 + $0x8] sm:$0xff pattern:$0x75316420]  ;;  %v158_v36 = vadd.f32 %v157_v29, %v156_v28 }
  0x22   :  { %v161_v33 = vsel %vm140_vm0, %v113_v31, 0.0  ;;  %v162_v34 = vsel %vm140_vm0, %v114_v32, 0.0  ;;  %281 = vmatpush.msra.mxu1 %v260_v11  ;;  %v257_v26 = vld [vmem:[#allocation8 + $0x20] sm:$0xff]  ;;  %v256_v29 = vld [vmem:[#allocation8 + $0x18] sm:$0xff]  ;;  %v255_v31 = vld [vmem:[#allocation8 + $0x10] sm:$0xff] }
  0x23   :  { %v163_v35 = vadd.f32 %v162_v34, %v161_v33  ;;  %v119_v37 = vld.sshfl [vmem:[#allocation1 + $0x20] sm:$0xff pattern:$0x75316420]  ;;  %v120_v38 = vld.sshfl [vmem:[#allocation1 + $0x28] sm:$0xff pattern:$0x75316420] }
  0x24   :  { %v171_v43 = vsel %vm140_vm0, %v119_v37, 0.0  ;;  %v172_v44 = vsel %vm140_vm0, %v120_v38, 0.0  ;;  %282 = vmatpush.msra.mxu1 %v259_v16  ;;  %v254_v32 = vld [vmem:[#allocation8 + $0x8] sm:$0xff]  ;;  %v253_v33 = vld [vmem:[#allocation8] sm:$0xff] }
  0x25   :  { %149 = vadd.xlane.f32.xlu0 %v148_v30  ;;  %164 = vadd.xlane.f32.xlu2 %v163_v35  ;;  %v116_v39 = vld.sshfl [vmem:[#allocation1 + $0x10] sm:$0xff pattern:$0x75316420]  ;;  %v117_v40 = vld.sshfl [vmem:[#allocation1 + $0x18] sm:$0xff pattern:$0x75316420]  ;;  %v173_v50 = vadd.f32 %v172_v44, %v171_v43 }
  0x26   :  { %v166_v41 = vsel %vm140_vm0, %v116_v39, 0.0  ;;  %v167_v42 = vsel %vm140_vm0, %v117_v40, 0.0  ;;  %283 = vmatpush.msra.mxu1 %v258_v21  ;;  %v346_v34 = vld [vmem:[%s531_s2] ss:$0 sm:$0xff] }
  0x27   :  { %159 = vadd.xlane.f32.xlu1 %v158_v36  ;;  %v122_v45 = vld.sshfl [vmem:[#allocation1 + $0x30] sm:$0xff pattern:$0x75316420]  ;;  %v123_v46 = vld.sshfl [vmem:[#allocation1 + $0x38] sm:$0xff pattern:$0x75316420]  ;;  %v168_v49 = vadd.f32 %v167_v42, %v166_v41 }
  0x28   :  { %v176_v47 = vsel %vm140_vm0, %v122_v45, 0.0  ;;  %v177_v48 = vsel %vm140_vm0, %v123_v46, 0.0  ;;  %284 = vmatpush.msra.mxu1 %v257_v26  ;;  %v347_v38 = vld [vmem:[%s533_s4] ss:$0 sm:$0xff] }
  0x29   :  { %v178_v51 = vadd.f32 %v177_v48, %v176_v47 }
  0x2a   :  { %285 = vmatpush.msra.mxu1 %v256_v29 }
  0x2c   :  { %286 = vmatpush.msra.mxu1 %v255_v31 }
  0x2d   :  { %169 = vadd.xlane.f32.xlu2 %v168_v49  ;;  %174 = vadd.xlane.f32.xlu0 %v173_v50 }
  0x2e   :  { %287 = vmatpush.msra.mxu1 %v254_v32 }
  0x2f   :  { %179 = vadd.xlane.f32.xlu1 %v178_v51 }
  0x30   :  { %288 = vmatpush.msra.mxu1 %v253_v33 }
  0x90   :  { %v145_v54 = vpop.xlane.xlu0 %144 }
  0x91   :  { %v191_v2 = vperm.slane %v145_v54, %v190_v61 }
  0x92   :  { %v155_v58 = vpop.xlane.xlu1 %154 }
  0x93   :  { %v193_v4 = vperm.slane %v155_v58, %v190_v61 }
  0x98   :  { %v150_v63 = vpop.xlane.xlu0 %149  ;;  %v165_v0 = vpop.xlane.xlu2 %164 }
  0x99   :  { %v192_v3 = vperm.slane %v150_v63, %v190_v61  ;;  %v195_v13 = vperm.slane %v165_v0, %v190_v61 }
  0x9a   :  { %v160_v5 = vpop.xlane.xlu1 %159 }
  0x9b   :  { %v200_v7 = vsel %vm199_vm2, %v192_v3, %v191_v2  ;;  %v194_v8 = vperm.slane %v160_v5, %v190_v61 }
  0x9c   :  { %v202_v9 = vsel %vm201_vm3, %v193_v4, %v200_v7 }
  0x9d   :  { %v204_v12 = vsel %vm203_vm4, %v194_v8, %v202_v9 }
  0x9e   :  { %v206_v19 = vsel %vm205_vm5, %v195_v13, %v204_v12 }
  0xa0   :  { %v170_v14 = vpop.xlane.xlu2 %169  ;;  %v175_v15 = vpop.xlane.xlu0 %174 }
  0xa1   :  { %v196_v17 = vperm.slane %v170_v14, %v190_v61  ;;  %v197_v18 = vperm.slane %v175_v15, %v190_v61 }
  0xa2   :  { %v180_v20 = vpop.xlane.xlu1 %179 }
  0xa3   :  { %v208_v22 = vsel %vm207_vm6, %v196_v17, %v206_v19  ;;  %v198_v23 = vperm.slane %v180_v20, %v190_v61 }
  0xa4   :  { %v210_v25 = vsel %vm209_vm7, %v197_v18, %v208_v22 }
  0xa5   :  { %v212_v27 = vsel %vm211_vm8, %v198_v23, %v210_v25 }
  0xa6   :  { %v214_v28 = vadd.f32 %v212_v27, %v88_v24 }
  0xa8   :  { %216 = vst.msk [vmem:[#allocation2] sm:$0xff] %vm70_vm1, %v214_v28 }
  0xaf   :  { %v220_v30 = vld [vmem:[#allocation2] sm:$0xff] }
  0xb0   :  { %315 = vmatmul.msk.f32.vlgmr.msra.gmra.mxu0 %vm70_vm1, %v220_v30 }
 0x12d   :  { %v249_v35 = vpop.f32.mrf.mxu0 }
 0x12e   :  { %v250_v36 = vadd.f32 %v346_v34, %v249_v35 }
 0x130   :  { %v252_v37 = vmax.f32 %v250_v36, 0.0 }
 0x132   :  { %289 = vmatmul.f32.vlgmr.msra.gmra.mxu1 %v252_v37 }
 0x1af   :  { %v290_v39 = vpop.f32.mrf.mxu1 }
 0x1b0   :  { %v291_v40 = vadd.f32 %v347_v38, %v290_v39 }
 0x1b2   :  { %293 = vst [vmem:[#allocation9] sm:$0xff] %v291_v40 }
 0x1b3   :  { %297 = vsyncadd [#allocation5], 96  ;;  %s300_s15 = sshll.u32 %s534_s5, 4  ;;  %s458_s16 = smov [#allocation9]   ;;  %s301_s15 = int_to_ptr.hbm [resolvable:$true] %s300_s15 }
 0x1b4   :  { %s298_s17 = sshll.u32 %s458_s16, 4  ;;  %s459_s2 = smov 32   ;;  %s299_s17 = int_to_ptr.vmem [resolvable:$true] %s298_s17 }
 0x1b5   :  { %s460_s18 = smov 2  }
 0x1b6   :  { %306 = dma.vmem_to_hbm [thread:$0]  %s299_s17, 32, %s301_s15, [#allocation5], %s459_s2, %s459_s2, %s460_s18  }
 0x1b7   :  { %448 = dma.done.wait [#allocation5], 128  }
 0x1b8   :  { %449 = vsyncadd [#allocation5], 4294967168 }
 0x1b9   :  { %311 = vsyncpa [#allocation4], 1 }
 0x1ba   :  { %312 = vsyncpa [#allocation7], 1 }
 0x1bb   :  { %313 = vsyncpa [#allocation5], 1 }

</bundles_post_ra>
